<compile_context>
chip_gen: v5e
topology: v5e:2x2
jax: 0.10.0
libtpu: 0.0.40
codegen_flags: <defaults>
</compile_context>

<pallas_src>
import jax
import jax.numpy as jnp
from jax.experimental import pallas as pl
from jax.experimental.pallas import tpu as pltpu

# Module hyperparameters (from the PyTorch source)
N_HEADS = 8
D_K = 2
D_V = 2
D_MODEL = 7
LN_EPS = 1e-5


def enc_self_attn_kernel(x_ref, bias_ref, wqkv_ref, bqkv_ref, head_sel_ref,
                         wo_ref, bo_ref, gamma_ref, beta_ref,
                         out_ref, attn_ref):
    BB, S, _ = x_ref.shape
    dqk = N_HEADS * D_K                               # 16 (== N_HEADS * D_V)

    x = x_ref[...]                                    # (BB, S, D)
    x2 = x.reshape(BB * S, D_MODEL)                   # (BB*S, D)

    # --- Fused QKV projection: one MXU matmul for all three linears.
    # The 1/sqrt(d_k) scale is already folded into the Q columns host-side.
    qkv = jnp.dot(x2, wqkv_ref[...],
                  preferred_element_type=jnp.float32) + bqkv_ref[...]   # (BB*S, 48)
    q = qkv[:, 0:dqk].reshape(BB, S, dqk)             # (BB, S, 16), pre-scaled
    k = qkv[:, dqk:2 * dqk].reshape(BB, S, dqk)
    v = qkv[:, 2 * dqk:3 * dqk].reshape(BB, S, dqk)

    # head_sel[h, c] = 1.0 iff column c belongs to head h (c // D_K == h); constant input.
    head_sel = head_sel_ref[...]                      # (H, 16)

    # Head-masked Q, stacked over heads: (BB, H*S, 16)
    q_big = (q[:, None, :, :] * head_sel[None, :, None, :]
             ).reshape(BB, N_HEADS * S, dqk)

    # --- All-head scores in ONE batched matmul, TRANSPOSED layout:
    # key axis (S=8) on sublanes, query axis (H*S=64) on lanes.
    scoresT = jnp.einsum('byc,bxc->byx', k, q_big,
                         preferred_element_type=jnp.float32)            # (BB, S, H*S)

    # Additive key-pad bias (-1e9 at padded keys), broadcast over the query lanes.
    scoresT = scoresT + bias_ref[...]                 # bias: (BB, S, 1)

    # --- One softmax over the key axis (axis=-2). EXACT division so the stored
    # attention rows sum to 1 (approx reciprocal previously broke this check).
    scoresT = scoresT - jnp.max(scoresT, axis=-2, keepdims=True)
    e = jnp.exp(scoresT)
    attnT = e / jnp.sum(e, axis=-2, keepdims=True)                       # (BB, S, H*S)

    # Lane-dense writeback: one (BB, 1, 512) slab per grid step (512 % 128 == 0).
    attn_ref[...] = attnT.reshape(BB, 1, S * N_HEADS * S).astype(attn_ref.dtype)

    # --- attn @ V for all heads in ONE batched matmul, then head-mask reduce.
    # ctx_all[b, h*S+i, c] = sum_j attnT[b, j, h*S+i] * v[b, j, c]; keep c//D_V == h.
    ctx_all = jnp.einsum('byx,byc->bxc', attnT, v,
                         preferred_element_type=jnp.float32)             # (BB, H*S, 16)
    ctx = jnp.sum(ctx_all.reshape(BB, N_HEADS, S, dqk)
                  * head_sel[None, :, None, :], axis=1)                  # (BB, S, 16)

    # --- Fused output projection + residual + LayerNorm ---
    proj = jnp.dot(ctx.reshape(BB * S, dqk), wo_ref[...],
                   preferred_element_type=jnp.float32) + bo_ref[...]     # (BB*S, 7)
    y = proj + x2
    mu = jnp.mean(y, axis=-1, keepdims=True)
    var = jnp.mean((y - mu) * (y - mu), axis=-1, keepdims=True)
    y = (y - mu) * jax.lax.rsqrt(var + jnp.float32(LN_EPS))
    y = y * gamma_ref[...] + beta_ref[...]
    out_ref[...] = y.reshape(BB, S, D_MODEL).astype(out_ref.dtype)


def _pick_batch_block(B, max_bb=256):
    """Largest divisor of B that is <= max_bb.

    Per-step footprint at S=8 is only a few KiB * BB, so big blocks amortize the
    ~0.35us per-grid-step overhead and fill the MXU row dimension. At small B
    this yields a single grid step (best on single-TC v5e/v6e); at large B the
    multi-step grid axis is marked "parallel" so v7x's two TCs split it.
    """
    best = 1
    for bb in range(1, min(B, max_bb) + 1):
        if B % bb == 0:
            best = bb
    return best


def encoder_self_attention(x, key_pad, params):
    """x: (B, S, d_model) f32 (enc_inputs); key_pad: (B, S) f32, 1.0 = padded key."""
    wq, bq, wk, bk, wv, bv, wo, bo, gamma, beta = params
    B, S, D = x.shape
    assert D == D_MODEL
    dqk = N_HEADS * D_K

    # Host-side prep (tiny, one-time): fused QKV weights with 1/sqrt(d_k) folded
    # into the Q columns; additive key-pad bias; constant head-selector matrix.
    scale = 1.0 / jnp.sqrt(jnp.float32(D_K))
    wqkv = jnp.concatenate([wq * scale, wk, wv], axis=1)          # (7, 48)
    bqkv = jnp.concatenate([bq * scale, bk, bv], axis=1)          # (1, 48)
    bias = (key_pad.astype(jnp.float32) * jnp.float32(-1e9)).reshape(B, S, 1)
    h_ids = jnp.arange(N_HEADS, dtype=jnp.int32)[:, None]
    c_ids = jnp.arange(dqk, dtype=jnp.int32)[None, :]
    head_sel = (c_ids // D_K == h_ids).astype(jnp.float32)        # (8, 16)

    BB = _pick_batch_block(B)
    grid = (B // BB,)

    full2d = lambda a: pl.BlockSpec(a.shape, lambda b: (0, 0))

    out_shapes = (
        jax.ShapeDtypeStruct((B, S, D_MODEL), jnp.float32),
        # All-head attention written as one lane-dense (1, H*S*S) slab per batch row;
        # reshaped/transposed to (B, H, S, S) on the host.
        jax.ShapeDtypeStruct((B, 1, S * N_HEADS * S), jnp.float32),
    )

    grid_spec = pltpu.PrefetchScalarGridSpec(
        num_scalar_prefetch=0,
        grid=grid,
        in_specs=[
            pl.BlockSpec((BB, S, D_MODEL), lambda b: (b, 0, 0)),   # enc_inputs
            pl.BlockSpec((BB, S, 1), lambda b: (b, 0, 0)),         # additive pad bias
            full2d(wqkv), full2d(bqkv), full2d(head_sel),
            full2d(wo), full2d(bo),
            full2d(gamma), full2d(beta),
        ],
        out_specs=[
            pl.BlockSpec((BB, S, D_MODEL), lambda b: (b, 0, 0)),
            pl.BlockSpec((BB, 1, S * N_HEADS * S), lambda b: (b, 0, 0)),
        ],
    )

    out, attn_flat = pl.pallas_call(
        enc_self_attn_kernel,
        out_shape=out_shapes,
        grid_spec=grid_spec,
        compiler_params=pltpu.CompilerParams(dimension_semantics=("parallel",)),
    )(x, bias, wqkv, bqkv, head_sel, wo, bo, gamma, beta)

    # attn_flat[b, 0, j*H*S + h*S + i] = attn[b, h, i, j]  (j = key, i = query)
    attn = attn_flat.reshape(B, S, N_HEADS, S).transpose(0, 2, 3, 1)
    return out, attn


def ref_encoder_self_attention(x, key_pad, params):
    """Pure-JAX reference mirroring the PyTorch MultiHeadAttention forward (Q=K=V=x)."""
    wq, bq, wk, bk, wv, bv, wo, bo, gamma, beta = params
    B, S, _ = x.shape
    with jax.default_matmul_precision("highest"):
        q_s = (x @ wq + bq).reshape(B, S, N_HEADS, D_K).transpose(0, 2, 1, 3)
        k_s = (x @ wk + bk).reshape(B, S, N_HEADS, D_K).transpose(0, 2, 1, 3)
        v_s = (x @ wv + bv).reshape(B, S, N_HEADS, D_V).transpose(0, 2, 1, 3)
        mask = jnp.broadcast_to(key_pad[:, None, None, :], (B, N_HEADS, S, S)) > 0.5
        scores = jnp.einsum("bhqd,bhkd->bhqk", q_s, k_s) / jnp.sqrt(jnp.float32(D_K))
        scores = jnp.where(mask, -1e9, scores)
        attn = jax.nn.softmax(scores, axis=-1)
        context = jnp.einsum("bhqk,bhkd->bhqd", attn, v_s)
        context = context.transpose(0, 2, 1, 3).reshape(B, S, N_HEADS * D_V)
        output = context @ wo + bo
    y = output + x
    mu = jnp.mean(y, axis=-1, keepdims=True)
    var = jnp.mean((y - mu) ** 2, axis=-1, keepdims=True)
    y = (y - mu) / jnp.sqrt(var + LN_EPS)
    return y * gamma + beta, attn


def init_params(key):
    """Deterministic parameter init (shapes from the module's __init__)."""
    ks = jax.random.split(key, 8)
    u = lambda k, shape, bound: jax.random.uniform(k, shape, jnp.float32, -bound, bound)
    b_in = 1.0 / jnp.sqrt(D_MODEL)
    b_out = 1.0 / jnp.sqrt(N_HEADS * D_V)
    wq = u(ks[0], (D_MODEL, D_K * N_HEADS), b_in)
    bq = u(ks[1], (1, D_K * N_HEADS), b_in)
    wk = u(ks[2], (D_MODEL, D_K * N_HEADS), b_in)
    bk = u(ks[3], (1, D_K * N_HEADS), b_in)
    wv = u(ks[4], (D_MODEL, D_V * N_HEADS), b_in)
    bv = u(ks[5], (1, D_V * N_HEADS), b_in)
    wo = u(ks[6], (N_HEADS * D_V, D_MODEL), b_out)
    bo = u(ks[7], (1, D_MODEL), b_out)
    gamma = jnp.ones((1, D_MODEL), jnp.float32)       # nn.LayerNorm default init
    beta = jnp.zeros((1, D_MODEL), jnp.float32)
    return (wq, bq, wk, bk, wv, bv, wo, bo, gamma, beta)


if __name__ == "__main__":
    B, S = 2, 8
    key = jax.random.PRNGKey(0)
    kx, kp = jax.random.split(key, 2)

    x = jax.random.normal(kx, (B, S, D_MODEL), jnp.float32)   # enc_inputs
    # Key-pad mask: batch 0 has no padding; batch 1 has its last 2 key positions padded.
    key_pad = jnp.zeros((B, S), jnp.float32).at[1, S - 2:].set(1.0)
    params = init_params(kp)

    out, attn = encoder_self_attention(x, key_pad, params)
    out = jax.block_until_ready(out)
    attn = jax.block_until_ready(attn)

    ref_out, ref_attn = ref_encoder_self_attention(x, key_pad, params)
    assert jnp.allclose(out, ref_out, atol=2e-3, rtol=2e-3), "output mismatch"
    assert jnp.allclose(attn, ref_attn, atol=2e-3, rtol=2e-3), "attn mismatch"
    # Exact softmax division -> rows sum to 1 at f32 precision.
    assert jnp.allclose(jnp.sum(attn, axis=-1), 1.0, atol=1e-3), "attn rows not normalized"

    print("KERNEL_OK")
</pallas_src>

<mosaic_0001>
module attributes {stable_mosaic.version = 11 : i64} {
  func.func @enc_self_attn_kernel(%arg0: i32, %arg1: memref<2x8x7xf32, #tpu.memory_space<vmem>>, %arg2: memref<2x8x1xf32, #tpu.memory_space<vmem>>, %arg3: memref<7x48xf32, #tpu.memory_space<vmem>>, %arg4: memref<1x48xf32, #tpu.memory_space<vmem>>, %arg5: memref<8x16xf32, #tpu.memory_space<vmem>>, %arg6: memref<16x7xf32, #tpu.memory_space<vmem>>, %arg7: memref<1x7xf32, #tpu.memory_space<vmem>>, %arg8: memref<1x7xf32, #tpu.memory_space<vmem>>, %arg9: memref<1x7xf32, #tpu.memory_space<vmem>>, %arg10: memref<2x8x7xf32, #tpu.memory_space<vmem>>, %arg11: memref<2x1x512xf32, #tpu.memory_space<vmem>>) attributes {dimension_semantics = [#tpu.dimension_semantics<parallel>], iteration_bounds = array<i64: 1>, scalar_prefetch = 0 : i64, scratch_operands = 0 : i64, tpu.core_type = #tpu.core_type<tc>, window_params = [{transform_indices = @transform_0, window_bounds = array<i64: 2, 8, 7>}, {transform_indices = @transform_1, window_bounds = array<i64: 2, 8, 1>}, {pipeline_mode = #tpu.pipeline_mode<synchronous>, transform_indices = @transform_2, window_bounds = array<i64: 7, 48>}, {pipeline_mode = #tpu.pipeline_mode<synchronous>, transform_indices = @transform_3, window_bounds = array<i64: 1, 48>}, {pipeline_mode = #tpu.pipeline_mode<synchronous>, transform_indices = @transform_4, window_bounds = array<i64: 8, 16>}, {pipeline_mode = #tpu.pipeline_mode<synchronous>, transform_indices = @transform_5, window_bounds = array<i64: 16, 7>}, {pipeline_mode = #tpu.pipeline_mode<synchronous>, transform_indices = @transform_6, window_bounds = array<i64: 1, 7>}, {pipeline_mode = #tpu.pipeline_mode<synchronous>, transform_indices = @transform_7, window_bounds = array<i64: 1, 7>}, {pipeline_mode = #tpu.pipeline_mode<synchronous>, transform_indices = @transform_8, window_bounds = array<i64: 1, 7>}, {transform_indices = @transform_9, window_bounds = array<i64: 2, 8, 7>}, {transform_indices = @transform_10, window_bounds = array<i64: 2, 1, 512>}]} {
    %c0 = arith.constant 0 : index
    %c0_0 = arith.constant 0 : index
    %c0_1 = arith.constant 0 : index
    %0 = vector.load %arg1[%c0, %c0_0, %c0_1] : memref<2x8x7xf32, #tpu.memory_space<vmem>>, vector<2x8x7xf32>
    %1 = vector.shape_cast %0 : vector<2x8x7xf32> to vector<16x7xf32>
    %c0_2 = arith.constant 0 : index
    %c0_3 = arith.constant 0 : index
    %2 = vector.load %arg3[%c0_2, %c0_3] : memref<7x48xf32, #tpu.memory_space<vmem>>, vector<7x48xf32>
    %cst = arith.constant dense<0.000000e+00> : vector<16x48xf32>
    %3 = tpu.matmul %1, %2, %cst {dimension_numbers = #tpu.dot_dimension_numbers<[1], [0], [0], [1], [0, 0, 1, 1], [], []>} : vector<16x7xf32>, vector<7x48xf32>, vector<16x48xf32> -> vector<16x48xf32>
    %c0_4 = arith.constant 0 : index
    %c0_5 = arith.constant 0 : index
    %4 = vector.load %arg4[%c0_4, %c0_5] : memref<1x48xf32, #tpu.memory_space<vmem>>, vector<1x48xf32>
    %5 = vector.broadcast %4 : vector<1x48xf32> to vector<16x48xf32>
    %6 = arith.addf %3, %5 : vector<16x48xf32>
    %7 = vector.extract_strided_slice %6 {offsets = [0, 0], sizes = [16, 16], strides = [1, 1]} : vector<16x48xf32> to vector<16x16xf32>
    %8 = vector.shape_cast %7 : vector<16x16xf32> to vector<2x8x16xf32>
    %9 = vector.extract_strided_slice %6 {offsets = [0, 16], sizes = [16, 16], strides = [1, 1]} : vector<16x48xf32> to vector<16x16xf32>
    %10 = vector.shape_cast %9 : vector<16x16xf32> to vector<2x8x16xf32>
    %11 = vector.extract_strided_slice %6 {offsets = [0, 32], sizes = [16, 16], strides = [1, 1]} : vector<16x48xf32> to vector<16x16xf32>
    %12 = vector.shape_cast %11 : vector<16x16xf32> to vector<2x8x16xf32>
    %c0_6 = arith.constant 0 : index
    %c0_7 = arith.constant 0 : index
    %13 = vector.load %arg5[%c0_6, %c0_7] : memref<8x16xf32, #tpu.memory_space<vmem>>, vector<8x16xf32>
    %14 = vector.shape_cast %8 : vector<2x8x16xf32> to vector<2x1x8x16xf32>
    %15 = vector.shape_cast %13 : vector<8x16xf32> to vector<1x8x1x16xf32>
    %16 = vector.broadcast %14 : vector<2x1x8x16xf32> to vector<2x8x8x16xf32>
    %17 = vector.broadcast %15 : vector<1x8x1x16xf32> to vector<2x8x8x16xf32>
    %18 = arith.mulf %16, %17 : vector<2x8x8x16xf32>
    %19 = vector.shape_cast %18 : vector<2x8x8x16xf32> to vector<2x64x16xf32>
    "tpu.trace_start"() <{level = 10 : i32, message = "byc,bxc->byx"}> : () -> ()
    %cst_8 = arith.constant dense<0.000000e+00> : vector<2x8x64xf32>
    %20 = tpu.matmul %10, %19, %cst_8 {dimension_numbers = #tpu.dot_dimension_numbers<[2], [2], [1], [1], [0, 0, 0, 1, 1, 1], [0], [0]>} : vector<2x8x16xf32>, vector<2x64x16xf32>, vector<2x8x64xf32> -> vector<2x8x64xf32>
    "tpu.trace_stop"() : () -> ()
    %c0_9 = arith.constant 0 : index
    %c0_10 = arith.constant 0 : index
    %c0_11 = arith.constant 0 : index
    %21 = vector.load %arg2[%c0_9, %c0_10, %c0_11] : memref<2x8x1xf32, #tpu.memory_space<vmem>>, vector<2x8x1xf32>
    %22 = vector.broadcast %21 : vector<2x8x1xf32> to vector<2x8x64xf32>
    %23 = arith.addf %20, %22 : vector<2x8x64xf32>
    %cst_12 = arith.constant dense<0xFF800000> : vector<2x64xf32>
    %24 = vector.multi_reduction <maximumf>, %23, %cst_12 [1] : vector<2x8x64xf32> to vector<2x64xf32>
    %25 = vector.shape_cast %24 : vector<2x64xf32> to vector<2x1x64xf32>
    %26 = vector.broadcast %25 : vector<2x1x64xf32> to vector<2x8x64xf32>
    %27 = arith.subf %23, %26 : vector<2x8x64xf32>
    %28 = math.exp %27 : vector<2x8x64xf32>
    %cst_13 = arith.constant dense<0.000000e+00> : vector<2x64xf32>
    %29 = vector.multi_reduction <add>, %28, %cst_13 [1] : vector<2x8x64xf32> to vector<2x64xf32>
    %30 = vector.shape_cast %29 : vector<2x64xf32> to vector<2x1x64xf32>
    %31 = vector.broadcast %30 : vector<2x1x64xf32> to vector<2x8x64xf32>
    %32 = arith.divf %28, %31 : vector<2x8x64xf32>
    %33 = vector.shape_cast %32 : vector<2x8x64xf32> to vector<2x1x512xf32>
    %c0_14 = arith.constant 0 : index
    %c0_15 = arith.constant 0 : index
    %c0_16 = arith.constant 0 : index
    %34 = vector.load %arg11[%c0_14, %c0_15, %c0_16] : memref<2x1x512xf32, #tpu.memory_space<vmem>>, vector<2x1x512xf32>
    tpu.vector_store %arg11[%c0_14, %c0_15, %c0_16], %33 {strides = array<i32>} : memref<2x1x512xf32, #tpu.memory_space<vmem>>, vector<2x1x512xf32>,
    "tpu.trace_start"() <{level = 10 : i32, message = "byx,byc->bxc"}> : () -> ()
    %cst_17 = arith.constant dense<0.000000e+00> : vector<2x64x16xf32>
    %35 = tpu.matmul %32, %12, %cst_17 {dimension_numbers = #tpu.dot_dimension_numbers<[1], [1], [2], [2], [0, 0, 0, 2, 1, 2], [0], [0]>} : vector<2x8x64xf32>, vector<2x8x16xf32>, vector<2x64x16xf32> -> vector<2x64x16xf32>
    "tpu.trace_stop"() : () -> ()
    %36 = vector.shape_cast %35 : vector<2x64x16xf32> to vector<2x8x8x16xf32>
    %37 = vector.shape_cast %13 : vector<8x16xf32> to vector<1x8x1x16xf32>
    %38 = vector.broadcast %37 : vector<1x8x1x16xf32> to vector<2x8x8x16xf32>
    %39 = arith.mulf %36, %38 : vector<2x8x8x16xf32>
    %cst_18 = arith.constant dense<0.000000e+00> : vector<2x8x16xf32>
    %40 = vector.multi_reduction <add>, %39, %cst_18 [1] : vector<2x8x8x16xf32> to vector<2x8x16xf32>
    %41 = vector.shape_cast %40 : vector<2x8x16xf32> to vector<16x16xf32>
    %c0_19 = arith.constant 0 : index
    %c0_20 = arith.constant 0 : index
    %42 = vector.load %arg6[%c0_19, %c0_20] : memref<16x7xf32, #tpu.memory_space<vmem>>, vector<16x7xf32>
    %cst_21 = arith.constant dense<0.000000e+00> : vector<16x7xf32>
    %43 = tpu.matmul %41, %42, %cst_21 {dimension_numbers = #tpu.dot_dimension_numbers<[1], [0], [0], [1], [0, 0, 1, 1], [], []>} : vector<16x16xf32>, vector<16x7xf32>, vector<16x7xf32> -> vector<16x7xf32>
    %c0_22 = arith.constant 0 : index
    %c0_23 = arith.constant 0 : index
    %44 = vector.load %arg7[%c0_22, %c0_23] : memref<1x7xf32, #tpu.memory_space<vmem>>, vector<1x7xf32>
    %45 = vector.broadcast %44 : vector<1x7xf32> to vector<16x7xf32>
    %46 = arith.addf %43, %45 : vector<16x7xf32>
    %47 = arith.addf %46, %1 : vector<16x7xf32>
    %cst_24 = arith.constant dense<0.000000e+00> : vector<16xf32>
    %48 = vector.multi_reduction <add>, %47, %cst_24 [1] : vector<16x7xf32> to vector<16xf32>
    %49 = vector.shape_cast %48 : vector<16xf32> to vector<16x1xf32>
    %cst_25 = arith.constant 7.000000e+00 : f32
    %50 = vector.broadcast %cst_25 : f32 to vector<16x1xf32>
    %51 = arith.divf %49, %50 : vector<16x1xf32>
    %52 = vector.broadcast %51 : vector<16x1xf32> to vector<16x7xf32>
    %53 = arith.subf %47, %52 : vector<16x7xf32>
    %54 = vector.broadcast %51 : vector<16x1xf32> to vector<16x7xf32>
    %55 = arith.subf %47, %54 : vector<16x7xf32>
    %56 = arith.mulf %53, %55 : vector<16x7xf32>
    %cst_26 = arith.constant dense<0.000000e+00> : vector<16xf32>
    %57 = vector.multi_reduction <add>, %56, %cst_26 [1] : vector<16x7xf32> to vector<16xf32>
    %58 = vector.shape_cast %57 : vector<16xf32> to vector<16x1xf32>
    %cst_27 = arith.constant 7.000000e+00 : f32
    %59 = vector.broadcast %cst_27 : f32 to vector<16x1xf32>
    %60 = arith.divf %58, %59 : vector<16x1xf32>
    %61 = vector.broadcast %51 : vector<16x1xf32> to vector<16x7xf32>
    %62 = arith.subf %47, %61 : vector<16x7xf32>
    %cst_28 = arith.constant 9.99999974E-6 : f32
    %63 = vector.broadcast %cst_28 : f32 to vector<16x1xf32>
    %64 = arith.addf %60, %63 : vector<16x1xf32>
    %65 = math.rsqrt %64 : vector<16x1xf32>
    %66 = vector.broadcast %65 : vector<16x1xf32> to vector<16x7xf32>
    %67 = arith.mulf %62, %66 : vector<16x7xf32>
    %c0_29 = arith.constant 0 : index
    %c0_30 = arith.constant 0 : index
    %68 = vector.load %arg8[%c0_29, %c0_30] : memref<1x7xf32, #tpu.memory_space<vmem>>, vector<1x7xf32>
    %69 = vector.broadcast %68 : vector<1x7xf32> to vector<16x7xf32>
    %70 = arith.mulf %67, %69 : vector<16x7xf32>
    %c0_31 = arith.constant 0 : index
    %c0_32 = arith.constant 0 : index
    %71 = vector.load %arg9[%c0_31, %c0_32] : memref<1x7xf32, #tpu.memory_space<vmem>>, vector<1x7xf32>
    %72 = vector.broadcast %71 : vector<1x7xf32> to vector<16x7xf32>
    %73 = arith.addf %70, %72 : vector<16x7xf32>
    %74 = vector.shape_cast %73 : vector<16x7xf32> to vector<2x8x7xf32>
    %c0_33 = arith.constant 0 : index
    %c0_34 = arith.constant 0 : index
    %c0_35 = arith.constant 0 : index
    %75 = vector.load %arg10[%c0_33, %c0_34, %c0_35] : memref<2x8x7xf32, #tpu.memory_space<vmem>>, vector<2x8x7xf32>
    tpu.vector_store %arg10[%c0_33, %c0_34, %c0_35], %74 {strides = array<i32>} : memref<2x8x7xf32, #tpu.memory_space<vmem>>, vector<2x8x7xf32>,
    return
  }
  func.func @transform_0(%arg0: i32) -> (i32, i32, i32) {
    %c0_i32 = arith.constant 0 : i32
    %c0_i32_0 = arith.constant 0 : i32
    %c0_i32_1 = arith.constant 0 : i32
    return %arg0, %c0_i32, %c0_i32_0 : i32, i32, i32
  }
  func.func @transform_1(%arg0: i32) -> (i32, i32, i32) {
    %c0_i32 = arith.constant 0 : i32
    %c0_i32_0 = arith.constant 0 : i32
    %c0_i32_1 = arith.constant 0 : i32
    return %arg0, %c0_i32, %c0_i32_0 : i32, i32, i32
  }
  func.func @transform_2(%arg0: i32) -> (i32, i32) {
    %c0_i32 = arith.constant 0 : i32
    %c0_i32_0 = arith.constant 0 : i32
    %c0_i32_1 = arith.constant 0 : i32
    return %c0_i32, %c0_i32_0 : i32, i32
  }
  func.func @transform_3(%arg0: i32) -> (i32, i32) {
    %c0_i32 = arith.constant 0 : i32
    %c0_i32_0 = arith.constant 0 : i32
    %c0_i32_1 = arith.constant 0 : i32
    return %c0_i32, %c0_i32_0 : i32, i32
  }
  func.func @transform_4(%arg0: i32) -> (i32, i32) {
    %c0_i32 = arith.constant 0 : i32
    %c0_i32_0 = arith.constant 0 : i32
    %c0_i32_1 = arith.constant 0 : i32
    return %c0_i32, %c0_i32_0 : i32, i32
  }
  func.func @transform_5(%arg0: i32) -> (i32, i32) {
    %c0_i32 = arith.constant 0 : i32
    %c0_i32_0 = arith.constant 0 : i32
    %c0_i32_1 = arith.constant 0 : i32
    return %c0_i32, %c0_i32_0 : i32, i32
  }
  func.func @transform_6(%arg0: i32) -> (i32, i32) {
    %c0_i32 = arith.constant 0 : i32
    %c0_i32_0 = arith.constant 0 : i32
    %c0_i32_1 = arith.constant 0 : i32
    return %c0_i32, %c0_i32_0 : i32, i32
  }
  func.func @transform_7(%arg0: i32) -> (i32, i32) {
    %c0_i32 = arith.constant 0 : i32
    %c0_i32_0 = arith.constant 0 : i32
    %c0_i32_1 = arith.constant 0 : i32
    return %c0_i32, %c0_i32_0 : i32, i32
  }
  func.func @transform_8(%arg0: i32) -> (i32, i32) {
    %c0_i32 = arith.constant 0 : i32
    %c0_i32_0 = arith.constant 0 : i32
    %c0_i32_1 = arith.constant 0 : i32
    return %c0_i32, %c0_i32_0 : i32, i32
  }
  func.func @transform_9(%arg0: i32) -> (i32, i32, i32) {
    %c0_i32 = arith.constant 0 : i32
    %c0_i32_0 = arith.constant 0 : i32
    %c0_i32_1 = arith.constant 0 : i32
    return %arg0, %c0_i32, %c0_i32_0 : i32, i32, i32
  }
  func.func @transform_10(%arg0: i32) -> (i32, i32, i32) {
    %c0_i32 = arith.constant 0 : i32
    %c0_i32_0 = arith.constant 0 : i32
    %c0_i32_1 = arith.constant 0 : i32
    return %arg0, %c0_i32, %c0_i32_0 : i32, i32, i32
  }
}

</mosaic_0001>

<bundles_post_ra>
// kernel: tpu_custom_call.1
= control target key start
LH: loop header
LB: loop body
LE: loop exit
PB: predicated region body
PF: predicated region fallthrough
CT: control target
= control target key end

     0   :  { %vm49_vm0 = vcmask 1046528   ;;  %vm42_vm1 = vcmask 56320   ;;  %s1235_s0 = inlined_call_operand.vmem [shape: f32[2,8,7], index: 0, kind: input, shape index: {}]   ;;  %s1236_s1 = inlined_call_operand.vmem [shape: f32[2,8,1], index: 1, kind: input, shape index: {}]   ;;  %s1237_s2 = inlined_call_operand.vmem [shape: f32[7,48], index: 2, kind: input, shape index: {}]   ;;  %s1238_s3 = inlined_call_operand.vmem [shape: f32[1,48], index: 3, kind: input, shape index: {}]   ;;  %s1239_s4 = inlined_call_operand.vmem [shape: f32[8,16], index: 4, kind: input, shape index: {}]   ;;  %s1240_s5 = inlined_call_operand.vmem [shape: f32[16,7], index: 5, kind: input, shape index: {}]   ;;  %s1241_s6 = inlined_call_operand.vmem [shape: f32[1,7], index: 6, kind: input, shape index: {}]   ;;  %s1242_s7 = inlined_call_operand.vmem [shape: f32[1,7], index: 7, kind: input, shape index: {}]   ;;  %s1243_s8 = inlined_call_operand.vmem [shape: f32[1,7], index: 8, kind: input, shape index: {}]   ;;  %s1244_s9 = inlined_call_operand.vmem [shape: f32[2,8,7], index: 9, kind: output, shape index: {0}]   ;;  %s1245_s10 = inlined_call_operand.hbm [shape: f32[2,1,512], index: 10, kind: output, shape index: {1}]  }
   0x1   :  { %v37_v0 = vld [vmem:[%s1237_s2] sm:$0x7f] }
   0x2   :  { %v984_v1 = vld [vmem:[%s1235_s0] sm:$0xff]  ;;  %812 = vmatpush.msk.msra.mxu2 %vm49_vm0, %v37_v0 }
   0x3   :  { %813 = vmatmul.msk.f32.vlgmr.msra.gmra.mxu2 %vm42_vm1, %v984_v1 }
   0x4   :  { %16 = vsyncpa [#allocation3], 0  ;;  %v991_v2 = vld [vmem:[%s1235_s0 + $0x8] sm:$0xff]  ;;  %v76_v3 = vld [vmem:[%s1239_s4] sm:$0xff]  ;;  %vm132_vm2 = vcmask 130048   ;;  %s914_s0 = smov 112  }
   0x5   :  { %v84_v4 = vrot.slane %v76_v3, 7  ;;  %v870_v5 = vld [vmem:[%s1238_s3] ss:$0 sm:$0xff]  ;;  %v83_v7 = vrot.slane %v76_v3, 6  ;;  %v82_v12 = vrot.slane %v76_v3, 5  ;;  %v81_v16 = vrot.slane %v76_v3, 4 }
   0x6   :  { %v80_v22 = vrot.slane %v76_v3, 3  ;;  %s915_s3 = smov 96   ;;  %v79_v26 = vrot.slane %v76_v3, 2  ;;  %v78_v30 = vrot.slane %v76_v3, 1  ;;  %v1037_v36 = vperm.slane %v76_v3, 0  ;;  %v117_v42 = vld [vmem:[%s1236_s1] sm:$0xff] }
   0x7   :  { %v1001_v6 = vperm.slane %v84_v4, 0  ;;  %v1004_v11 = vperm.slane %v83_v7, 0  ;;  %v1008_v15 = vperm.slane %v82_v12, 0  ;;  %v1013_v21 = vperm.slane %v81_v16, 0  ;;  %v118_v43 = vld [vmem:[%s1236_s1 + $0x8] sm:$0xff]  ;;  %s919_s1 = smov 64  }
   0x8   :  { %v1019_v25 = vperm.slane %v80_v22, 0  ;;  %v1025_v29 = vperm.slane %v79_v26, 0  ;;  %v1031_v33 = vperm.slane %v78_v30, 0  ;;  %v916_v41 = vmov 0   ;;  %s798_s15 = sshll.u32 %s1245_s10, 4  ;;  %s921_s16 = smov [#allocation2]   ;;  %s799_s15 = int_to_ptr.hbm [resolvable:$true] %s798_s15 }
   0x9   :  { %863 = vset.pattern.permute.xlu1 %v916_v41  ;;  %vm228_vm3 = vcmask 523264   ;;  %vm294_vm8 = vcmask 1047556   ;;  %vm476_vm13 = vcmask 64512   ;;  %vm424_vm15 = vcmask 1040384   ;;  %s796_s17 = sshll.u32 %s921_s16, 4  ;;  %s922_s10 = smov 4   ;;  %s797_s17 = int_to_ptr.vmem [resolvable:$true] %s796_s17 }
   0xa   :  { %121 = vperm.xlu1 %863, %v117_v42   ;;  %vm426_vm0 = vcmask 1042434  }
   0xb   :  { %814 = vmatmul.msk.f32.gmra.mxu2 %vm42_vm1, %v991_v2 }
  0x12   :  { %126 = vperm.xlu1 %863, %v118_v43  }
  0x7c   :  { %v122_v49 = vpop.permute.xlu1 %121 }
  0x84   :  { %v127_v59 = vpop.permute.xlu1 %126 }
  0x86   :  { %v70_v8 = vpop.f32.mrf.mxu2 }
  0x87   :  { %v71_v9 = vadd.f32 %v870_v5, %v70_v8 }
  0x89   :  { %130 = vrot.lane.b32.xlu0 %v71_v9, %s914_s0  ;;  %v108_v10 = vmul.f32 %v1001_v6, %v71_v9  ;;  %v107_v13 = vmul.f32 %v1004_v11, %v71_v9  ;;  %v106_v20 = vmul.f32 %v1008_v15, %v71_v9  ;;  %v105_v24 = vmul.f32 %v1013_v21, %v71_v9 }
  0x8a   :  { %v104_v28 = vmul.f32 %v1019_v25, %v71_v9  ;;  %v103_v32 = vmul.f32 %v1025_v29, %v71_v9  ;;  %v102_v35 = vmul.f32 %v1031_v33, %v71_v9  ;;  %v101_v38 = vmul.f32 %v1037_v36, %v71_v9 }
  0x8b   :  { %815 = vmatpush.xpose.msk.msra.mxu1 %vm132_vm2, %v108_v10 }
  0x8e   :  { %v73_v14 = vpop.f32.mrf.mxu2 }
  0x8f   :  { %v74_v17 = vadd.f32 %v870_v5, %v73_v14  ;;  %816 = vmatpush.xpose.msk.msra.mxu1 %vm132_vm2, %v107_v13 }
  0x91   :  { %180 = vrot.lane.b32.xlu0 %v74_v17, %s914_s0  ;;  %v116_v18 = vmul.f32 %v1001_v6, %v74_v17  ;;  %v864_v19 = vpack.i.bf16 %v74_v17, %v71_v9  ;;  %v115_v23 = vmul.f32 %v1004_v11, %v74_v17  ;;  %v114_v27 = vmul.f32 %v1008_v15, %v74_v17 }
  0x92   :  { %v113_v31 = vmul.f32 %v1013_v21, %v74_v17  ;;  %v112_v34 = vmul.f32 %v1019_v25, %v74_v17  ;;  %v111_v37 = vmul.f32 %v1025_v29, %v74_v17  ;;  %v110_v39 = vmul.f32 %v1031_v33, %v74_v17 }
  0x93   :  { %824 = vmatpush.xpose.msk.msrb.mxu2 %vm132_vm2, %v116_v18  ;;  %865 = vrot.lane.b32.xlu2 %v864_v19, %s915_s3  ;;  %v109_v40 = vmul.f32 %v1037_v36, %v74_v17 }
  0x94   :  { %817 = vmatpush.xpose.msk.msra.mxu1 %vm132_vm2, %v106_v20 }
  0x97   :  { %825 = vmatpush.xpose.msk.msrb.mxu2 %vm132_vm2, %v115_v23 }
  0x98   :  { %818 = vmatpush.xpose.msk.msra.mxu1 %vm132_vm2, %v105_v24 }
  0x9b   :  { %826 = vmatpush.xpose.msk.msrb.mxu2 %vm132_vm2, %v114_v27 }
  0x9c   :  { %819 = vmatpush.xpose.msk.msra.mxu1 %vm132_vm2, %v104_v28 }
  0x9f   :  { %827 = vmatpush.xpose.msk.msrb.mxu2 %vm132_vm2, %v113_v31 }
  0xa0   :  { %820 = vmatpush.xpose.msk.msra.mxu1 %vm132_vm2, %v103_v32 }
  0xa3   :  { %828 = vmatpush.xpose.msk.msrb.mxu2 %vm132_vm2, %v112_v34 }
  0xa4   :  { %821 = vmatpush.xpose.msk.msra.mxu1 %vm132_vm2, %v102_v35 }
  0xa7   :  { %829 = vmatpush.xpose.msk.msrb.mxu2 %vm132_vm2, %v111_v37 }
  0xa8   :  { %822 = vmatpush.xpose.msk.msra.mxu1 %vm132_vm2, %v101_v38 }
  0xab   :  { %830 = vmatpush.xpose.msk.msrb.mxu2 %vm132_vm2, %v110_v39 }
  0xaf   :  { %831 = vmatpush.xpose.msk.msrb.mxu2 %vm132_vm2, %v109_v40  ;;  %v917_v40 = vmov 1983009808  }
  0xb0   :  { %v297_v42 = vunpack.c.l.s4 %v917_v40 }
  0xed   :  { %v866_v44 = vpop.permute.xlu2 %865 }
  0xee   :  { %v867_v45 = vunpack.i.l.bf16 %v866_v44  ;;  %v868_v46 = vunpack.i.h.bf16 %v866_v44 }
  0xf0   :  { %516 = vmatpush.msra.mxu2 %v867_v45  ;;  %851 = vmatpush.msra.mxu3 %v867_v45  ;;  %v918_v45 = vmov 1934713408  }
  0xf1   :  { %616 = vmatpush.msra.mxu0 %v868_v46 }
  0xfb   :  { %v131_v47 = vpop.permute.xlu0 %130 }
  0xfc   :  { %823 = vmatmul.msk.f32.vlgmr.msra.gmra.mxu1 %vm132_vm2, %v131_v47 }
 0x103   :  { %v181_v48 = vpop.permute.xlu0 %180 }
 0x104   :  { %832 = vmatmul.msk.f32.vlgmr.msrb.gmra.mxu2 %vm132_vm2, %v181_v48 }
 0x105   :  { %852 = vmatpush.msrb.mxu2 %v868_v46  ;;  %v307_v46 = vunpack.c.l.s4 %v918_v45 }
 0x179   :  { %v176_v50 = vpop.f32.mrf.mxu1 }
 0x17a   :  { %v177_v51 = vadd.f32 %v176_v50, %v122_v49  ;;  %v298_v49 = vunpack.c.0.s8 %v297_v42 }
 0x17c   :  { %v229_v52 = vsel %vm228_vm3, %v177_v51, -inf }
 0x17d   :  { %v230_v53 = vrot.slane %v229_v52, 4 }
 0x17f   :  { %v231_v54 = vmax.f32 %v229_v52, %v230_v53  ;;  %v308_v52 = vunpack.c.0.s8 %v307_v46 }
 0x181   :  { %v232_v55 = vrot.slane %v231_v54, 2 }
 0x183   :  { %v233_v56 = vmax.f32 %v231_v54, %v232_v55 }
 0x185   :  { %v234_v57 = vrot.slane %v233_v56, 1 }
 0x187   :  { %v235_v58 = vmax.f32 %v233_v56, %v234_v57  ;;  %v225_v60 = vpop.f32.mrf.mxu2 }
 0x188   :  { %v226_v61 = vadd.f32 %v225_v60, %v127_v59 }
 0x189   :  { %v243_v62 = vsub.f32 %v177_v51, %v235_v58 }
 0x18a   :  { %v236_v63 = vsel %vm228_vm3, %v226_v61, -inf }
 0x18b   :  { %v245_v0 = vmul.f32 1.442695, %v243_v62  ;;  %v237_v3 = vrot.slane %v236_v63, 4 }
 0x18d   :  { %874 = vpow2.f32 %v245_v0  ;;  %v238_v4 = vmax.f32 %v236_v63, %v237_v3 }
 0x18f   :  { %v239_v5 = vrot.slane %v238_v4, 2 }
 0x191   :  { %v240_v7 = vmax.f32 %v238_v4, %v239_v5 }
 0x193   :  { %v875_v8 = vpop.eup %874  ;;  %v241_v9 = vrot.slane %v240_v7, 1 }
 0x194   :  { %v249_v10 = vsel %vm228_vm3, %v875_v8, 0.0 }
 0x195   :  { %v250_v12 = vrot.slane %v249_v10, 4  ;;  %v242_v13 = vmax.f32 %v240_v7, %v241_v9 }
 0x197   :  { %v251_v14 = vadd.f32 %v250_v12, %v249_v10  ;;  %v244_v16 = vsub.f32 %v226_v61, %v242_v13 }
 0x199   :  { %v252_v17 = vrot.slane %v251_v14, 2  ;;  %v247_v18 = vmul.f32 1.442695, %v244_v16 }
 0x19b   :  { %v253_v19 = vadd.f32 %v252_v17, %v251_v14  ;;  %876 = vpow2.f32 %v247_v18 }
 0x19d   :  { %v254_v20 = vrot.slane %v253_v19, 1 }
 0x19f   :  { %v255_v22 = vadd.f32 %v254_v20, %v253_v19 }
 0x1a1   :  { %v1061_v23 = vpop.eup %876  ;;  %878 = vrcp.f32 %v255_v22  ;;  %v274_v37 = vand.u32 2147483648, %v255_v22  ;;  %v272_v39 = vand.u32 2147483647, %v255_v22  ;;  %vm268_vm5 = vweird.f32 %v255_v22 }
 0x1a2   :  { %v256_v24 = vsel %vm228_vm3, %v1061_v23, 0.0 }
 0x1a3   :  { %v257_v26 = vrot.slane %v256_v24, 4  ;;  %v275_v47 = vor.u32 1.1754944e-38, %v274_v37  ;;  %vm273_vm7 = vcmp.eq.f32.partialorder %v272_v39, 8.507059e+37 }
 0x1a5   :  { %v258_v27 = vadd.f32 %v257_v26, %v256_v24 }
 0x1a7   :  { %v879_v28 = vpop.eup %878  ;;  %v259_v30 = vrot.slane %v258_v27, 2 }
 0x1a8   :  { %v264_v31 = vmul.f32 %v879_v28, %v255_v22  ;;  %vm269_vm4 = vweird.f32 %v879_v28 }
 0x1a9   :  { %v260_v32 = vadd.f32 %v259_v30, %v258_v27  ;;  %vm270_vm6 = vmor %vm268_vm5, %vm269_vm4 }
 0x1aa   :  { %v265_v34 = vsub.f32 1.0, %v264_v31 }
 0x1ab   :  { %v261_v35 = vrot.slane %v260_v32, 1 }
 0x1ac   :  { %v266_v38 = vmul.f32 %v879_v28, %v265_v34 }
 0x1ad   :  { %v262_v43 = vadd.f32 %v261_v35, %v260_v32 }
 0x1ae   :  { %v267_v44 = vadd.f32 %v879_v28, %v266_v38 }
 0x1af   :  { %880 = vrcp.f32 %v262_v43  ;;  %v287_v0 = vand.u32 2147483647, %v262_v43  ;;  %v289_v3 = vand.u32 2147483648, %v262_v43  ;;  %vm283_vm10 = vweird.f32 %v262_v43 }
 0x1b0   :  { %v271_v48 = vsel %vm270_vm6, %v879_v28, %v267_v44 }
 0x1b1   :  { %v276_v50 = vsel %vm273_vm7, %v275_v47, %v271_v48  ;;  %v290_v13 = vor.u32 1.1754944e-38, %v289_v3  ;;  %vm288_vm12 = vcmp.eq.f32.partialorder %v287_v0, 8.507059e+37 }
 0x1b2   :  { %v277_v51 = vmul.f32 %v875_v8, %v276_v50 }
 0x1b4   :  { %441 = vxpose.xlu2.b32.start.end [1/1] (short) (narrow) %v277_v51, 64  ;;  %v293_v53 = vrot.slane %v277_v51, 4  ;;  %v299_v54 = vperm.slane %v277_v51, %v298_v49 }
 0x1b5   :  { %v881_v55 = vpop.eup %880 }
 0x1b6   :  { %v1065_v56 = vperm.slane %v299_v54, %v308_v52  ;;  %v279_v57 = vmul.f32 %v881_v55, %v262_v43  ;;  %v304_v58 = vrot.slane %v299_v54, 4  ;;  %v295_v59 = vsel %vm294_vm8, 0.0, %v293_v53 }
 0x1b7   :  { %v303_v63 = vperm.slane %v295_v59, %v298_v49  ;;  %vm284_vm9 = vweird.f32 %v881_v55  ;;  %v688_v59 = vld [vmem:[%s1240_s5] sm:$0xff] }
 0x1b8   :  { %v324_v60 = vrot.slane %v1065_v56, 4  ;;  %v280_v61 = vsub.f32 1.0, %v279_v57  ;;  %v305_v62 = vsel %vm294_vm8, 0.0, %v304_v58  ;;  %vm285_vm11 = vmor %vm283_vm10, %vm284_vm9  ;;  %v689_v58 = vld [vmem:[%s1240_s5 + $0x8] sm:$0xff] }
 0x1b9   :  { %v1070_v4 = vperm.slane %v305_v62, %v308_v52  ;;  %v1073_v8 = vperm.slane %v303_v63, %v308_v52  ;;  %v314_v9 = vrot.slane %v303_v63, 4  ;;  %714 = vmatpush.msrb.mxu1 %v689_v58 }
 0x1ba   :  { %v325_v5 = vsel %vm294_vm8, 0.0, %v324_v60  ;;  %v281_v7 = vmul.f32 %v881_v55, %v280_v61 }
 0x1bb   :  { %372 = vrot.lane.b32.xlu1 %v325_v5, %s919_s1  ;;  %v315_v12 = vsel %vm294_vm8, 0.0, %v314_v9  ;;  %715 = vmatpush.msrb.mxu1 %v688_v59 }
 0x1bc   :  { %v282_v10 = vadd.f32 %v881_v55, %v281_v7  ;;  %v1077_v14 = vperm.slane %v315_v12, %v308_v52 }
 0x1be   :  { %v286_v16 = vsel %vm285_vm11, %v881_v55, %v282_v10 }
 0x1bf   :  { %v291_v17 = vsel %vm288_vm12, %v290_v13, %v286_v16 }
 0x1c0   :  { %v292_v18 = vmul.f32 %v1061_v23, %v291_v17 }
 0x1c2   :  { %542 = vxpose.xlu0.b32.start.end [1/1] (short) (narrow) %v292_v18, 64  ;;  %v332_v19 = vrot.slane %v292_v18, 4  ;;  %v337_v20 = vperm.slane %v292_v18, %v298_v49 }
 0x1c4   :  { %v1080_v22 = vperm.slane %v337_v20, %v308_v52  ;;  %v342_v24 = vrot.slane %v337_v20, 4  ;;  %v333_v26 = vsel %vm294_vm8, 0.0, %v332_v19 }
 0x1c5   :  { %v341_v27 = vperm.slane %v333_v26, %v298_v49 }
 0x1c6   :  { %v343_v28 = vsel %vm294_vm8, 0.0, %v342_v24 }
 0x1c7   :  { %v1084_v30 = vperm.slane %v343_v28, %v308_v52  ;;  %v1086_v31 = vperm.slane %v341_v27, %v308_v52  ;;  %v352_v32 = vrot.slane %v341_v27, 4 }
 0x1c9   :  { %v353_v34 = vsel %vm294_vm8, 0.0, %v352_v32 }
 0x1ca   :  { %v1089_v35 = vperm.slane %v353_v34, %v308_v52 }
 0x229   :  { %869 = vset.pattern.permute.xlu0 %v916_v41 }
 0x24d   :  { %v457_v23 = vpop.trf.xlu2 }
 0x24e   :  { %833 = vmatmul.msk.f32.vlgmr.msra.gmra.mxu2 %vm476_vm13, %v457_v23 }
 0x255   :  { %v458_v37 = vpop.trf.xlu2 }
 0x256   :  { %834 = vmatmul.msk.f32.vlgmr.msra.gmra.mxu3 %vm476_vm13, %v458_v37 }
 0x25d   :  { %v459_v38 = vpop.trf.xlu2 }
 0x25e   :  { %835 = vmatmul.msk.f32.gmra.mxu3 %vm476_vm13, %v459_v38 }
 0x265   :  { %v460_v39 = vpop.trf.xlu2 }
 0x266   :  { %v558_v40 = vpop.trf.xlu0  ;;  %836 = vmatmul.msk.f32.gmra.mxu3 %vm476_vm13, %v460_v39 }
 0x267   :  { %841 = vmatmul.msk.f32.vlgmr.msra.gmra.mxu0 %vm476_vm13, %v558_v40 }
 0x26d   :  { %v461_v42 = vpop.trf.xlu2 }
 0x26e   :  { %v559_v43 = vpop.trf.xlu0  ;;  %837 = vmatmul.msk.f32.gmra.mxu3 %vm476_vm13, %v461_v42 }
 0x26f   :  { %842 = vmatmul.msk.f32.gmra.mxu0 %vm476_vm13, %v559_v43 }
 0x275   :  { %v462_v41 = vpop.trf.xlu2 }
 0x276   :  { %v560_v44 = vpop.trf.xlu0  ;;  %838 = vmatmul.msk.f32.gmra.mxu3 %vm476_vm13, %v462_v41 }
 0x277   :  { %843 = vmatmul.msk.f32.gmra.mxu0 %vm476_vm13, %v560_v44 }
 0x27d   :  { %v463_v45 = vpop.trf.xlu2 }
 0x27e   :  { %v561_v46 = vpop.trf.xlu0  ;;  %839 = vmatmul.msk.f32.gmra.mxu3 %vm476_vm13, %v463_v45 }
 0x27f   :  { %844 = vmatmul.msk.f32.gmra.mxu0 %vm476_vm13, %v561_v46 }
 0x285   :  { %v464_v47 = vpop.trf.xlu2 }
 0x286   :  { %v562_v48 = vpop.trf.xlu0  ;;  %840 = vmatmul.msk.f32.gmra.mxu3 %vm476_vm13, %v464_v47 }
 0x287   :  { %845 = vmatmul.msk.f32.gmra.mxu0 %vm476_vm13, %v562_v48 }
 0x28e   :  { %v563_v49 = vpop.trf.xlu0 }
 0x28f   :  { %846 = vmatmul.msk.f32.gmra.mxu0 %vm476_vm13, %v563_v49 }
 0x296   :  { %v564_v50 = vpop.trf.xlu0 }
 0x297   :  { %847 = vmatmul.msk.f32.gmra.mxu0 %vm476_vm13, %v564_v50 }
 0x29e   :  { %v565_v51 = vpop.trf.xlu0 }
 0x29f   :  { %848 = vmatmul.msk.f32.vlgmr.msrb.gmra.mxu2 %vm476_vm13, %v565_v51 }
 0x2d1   :  { %v518_v62 = vpop.f32.mrf.mxu2 }
 0x2d2   :  { %v642_v0 = vmul.f32 %v518_v62, %v1037_v36 }
 0x2d4   :  { %v658_v9 = vsel %vm132_vm2, %v642_v0, 0.0 }
 0x2d9   :  { %v521_v52 = vpop.f32.mrf.mxu3 }
 0x2da   :  { %v643_v63 = vmul.f32 %v521_v52, %v1031_v33 }
 0x2dc   :  { %v659_v5 = vsel %vm132_vm2, %v643_v63, 0.0 }
 0x2dd   :  { %v660_v13 = vadd.f32 %v659_v5, %v658_v9 }
 0x2e1   :  { %v524_v53 = vpop.f32.mrf.mxu3 }
 0x2e2   :  { %v644_v7 = vmul.f32 %v524_v53, %v1025_v29 }
 0x2e4   :  { %v618_v54 = vpop.f32.mrf.mxu0  ;;  %v661_v16 = vsel %vm132_vm2, %v644_v7, 0.0 }
 0x2e5   :  { %v662_v24 = vadd.f32 %v661_v16, %v660_v13  ;;  %v650_v46 = vmul.f32 %v618_v54, %v1037_v36 }
 0x2e7   :  { %v673_v50 = vsel %vm132_vm2, %v650_v46, 0.0 }
 0x2e9   :  { %v527_v55 = vpop.f32.mrf.mxu3 }
 0x2ea   :  { %v645_v12 = vmul.f32 %v527_v55, %v1019_v25 }
 0x2ec   :  { %v621_v57 = vpop.f32.mrf.mxu0  ;;  %v663_v19 = vsel %vm132_vm2, %v645_v12, 0.0 }
 0x2ed   :  { %v664_v28 = vadd.f32 %v663_v19, %v662_v24  ;;  %v651_v45 = vmul.f32 %v621_v57, %v1031_v33  ;;  %v364_v19 = vrot.slane %v1084_v30, 4 }
 0x2ef   :  { %v674_v48 = vsel %vm132_vm2, %v651_v45, 0.0 }
 0x2f0   :  { %v675_v53 = vadd.f32 %v674_v48, %v673_v50 }
 0x2f1   :  { %v530_v60 = vpop.f32.mrf.mxu3 }
 0x2f2   :  { %v646_v17 = vmul.f32 %v530_v60, %v1013_v21 }
 0x2f4   :  { %v624_v61 = vpop.f32.mrf.mxu0  ;;  %v665_v26 = vsel %vm132_vm2, %v646_v17, 0.0 }
 0x2f5   :  { %v666_v23 = vadd.f32 %v665_v26, %v664_v28  ;;  %v652_v47 = vmul.f32 %v624_v61, %v1025_v29  ;;  %v366_v26 = vrot.slane %v1086_v31, 4  ;;  %v330_v28 = vrot.slane %v1077_v14, 4 }
 0x2f7   :  { %v676_v51 = vsel %vm132_vm2, %v652_v47, 0.0 }
 0x2f8   :  { %v677_v57 = vadd.f32 %v676_v51, %v675_v53 }
 0x2f9   :  { %v533_v3 = vpop.f32.mrf.mxu3 }
 0x2fa   :  { %v647_v20 = vmul.f32 %v533_v3, %v1008_v15 }
 0x2fc   :  { %v627_v10 = vpop.f32.mrf.mxu0  ;;  %v667_v32 = vsel %vm132_vm2, %v647_v20, 0.0  ;;  %v365_v20 = vsel %vm294_vm8, 0.0, %v364_v19 }
 0x2fd   :  { %v668_v38 = vadd.f32 %v667_v32, %v666_v23  ;;  %v653_v49 = vmul.f32 %v627_v10, %v1019_v25  ;;  %v331_v32 = vsel %vm294_vm8, 0.0, %v330_v28 }
 0x2ff   :  { %v678_v58 = vsel %vm132_vm2, %v653_v49, 0.0 }
 0x300   :  { %v679_v54 = vadd.f32 %v678_v58, %v677_v57 }
 0x301   :  { %v536_v18 = vpop.f32.mrf.mxu3 }
 0x302   :  { %v648_v27 = vmul.f32 %v536_v18, %v1004_v11  ;;  %v326_v18 = vrot.slane %v1070_v4, 4 }
 0x304   :  { %v630_v34 = vpop.f32.mrf.mxu0  ;;  %v669_v37 = vsel %vm132_vm2, %v648_v27, 0.0  ;;  %v367_v27 = vsel %vm294_vm8, 0.0, %v366_v26 }
 0x305   :  { %v670_v42 = vadd.f32 %v669_v37, %v668_v38  ;;  %v654_v52 = vmul.f32 %v630_v34, %v1013_v21  ;;  %v920_v34 = vmov 7.0  }
 0x306   :  { %882 = vrcp.f32 %v920_v34 }
 0x307   :  { %v680_v36 = vsel %vm132_vm2, %v654_v52, 0.0 }
 0x308   :  { %v681_v59 = vadd.f32 %v680_v36, %v679_v54 }
 0x309   :  { %v539_v39 = vpop.f32.mrf.mxu3 }
 0x30a   :  { %v649_v40 = vmul.f32 %v539_v39, %v1001_v6 }
 0x30c   :  { %v671_v43 = vsel %vm132_vm2, %v649_v40, 0.0  ;;  %v633_v44 = vpop.f32.mrf.mxu0  ;;  %v883_v23 = vpop.eup %882 }
 0x30d   :  { %v672_v41 = vadd.f32 %v671_v43, %v670_v42  ;;  %v655_v33 = vmul.f32 %v633_v44, %v1008_v15  ;;  %v732_v37 = vmul.f32 7.0, %v883_v23  ;;  %v373_v40 = vpop.permute.xlu1 %372  ;;  %vm736_vm14 = vweird.f32 %v883_v23 }
 0x30f   :  { %849 = vmatmul.msk.f32.vlgmr.msrb.gmra.mxu1 %vm132_vm2, %v672_v41  ;;  %v682_v25 = vsel %vm132_vm2, %v655_v33, 0.0  ;;  %v733_v38 = vsub.f32 1.0, %v732_v37 }
 0x310   :  { %v683_v61 = vadd.f32 %v682_v25, %v681_v59  ;;  %v368_v25 = vrot.slane %v1089_v35, 4 }
 0x311   :  { %v734_v39 = vmul.f32 %v883_v23, %v733_v38 }
 0x313   :  { %v735_v42 = vadd.f32 %v883_v23, %v734_v39 }
 0x314   :  { %v636_v55 = vpop.f32.mrf.mxu0 }
 0x315   :  { %v656_v29 = vmul.f32 %v636_v55, %v1004_v11  ;;  %v871_v11 = vld [vmem:[%s1241_s6] ss:$0 sm:$0xff]  ;;  %v737_v43 = vsel %vm736_vm14, %v883_v23, %v735_v42 }
 0x317   :  { %v684_v60 = vsel %vm132_vm2, %v656_v29, 0.0 }
 0x318   :  { %v685_v63 = vadd.f32 %v684_v60, %v683_v61  ;;  %v369_v60 = vsel %vm294_vm8, 0.0, %v368_v25 }
 0x322   :  { %v639_v62 = vpop.f32.mrf.mxu2 }
 0x323   :  { %v657_v21 = vmul.f32 %v639_v62, %v1001_v6  ;;  %v362_v6 = vrot.slane %v1080_v22, 4  ;;  %v435_v62 = vlaneseq }
 0x325   :  { %v686_v0 = vsel %vm132_vm2, %v657_v21, 0.0  ;;  %v363_v17 = vsel %vm294_vm8, 0.0, %v362_v6  ;;  %vm1197_vm4 = vcmp.lt.s32.totalorder %v435_v62, 512 }
 0x326   :  { %v687_v3 = vadd.f32 %v686_v0, %v685_v63 }
 0x328   :  { %850 = vmatmul.msk.f32.gmra.mxu1 %vm132_vm2, %v687_v3  ;;  %vm428_vm2 = vcmask 1041408  }
 0x38c   :  { %v717_v15 = vpop.f32.mrf.mxu1 }
 0x38d   :  { %v718_v5 = vadd.f32 %v871_v11, %v717_v15 }
 0x38f   :  { %v723_v7 = vadd.f32 %v718_v5, %v984_v1  ;;  %v327_v1 = vsel %vm294_vm8, 0.0, %v326_v18 }
 0x391   :  { %v725_v9 = vsel %vm42_vm1, %v723_v7, 0.0 }
 0x392   :  { %726 = vadd.xlane.f32.xlu1 %v725_v9 }
 0x3a5   :  { %v720_v10 = vpop.f32.mrf.mxu1 }
 0x3a6   :  { %v721_v12 = vadd.f32 %v871_v11, %v720_v10  ;;  %v402_v11 = vsel %vm228_vm3, %v1065_v56, %v373_v40 }
 0x3a8   :  { %v724_v13 = vadd.f32 %v721_v12, %v991_v2  ;;  %v328_v2 = vrot.slane %v1073_v8, 4 }
 0x3aa   :  { %v728_v16 = vsel %vm42_vm1, %v724_v13, 0.0  ;;  %v329_v24 = vsel %vm294_vm8, 0.0, %v328_v2 }
 0x3ab   :  { %729 = vadd.xlane.f32.xlu2 %v728_v16  ;;  %374 = vrot.lane.b32.xlu1 %v363_v17, %s919_s1  ;;  %v872_v17 = vld [vmem:[%s1242_s7] ss:$0 sm:$0xff] }
 0x3b3   :  { %380 = vrot.lane.b32.xlu1 %v327_v1, %s919_s1  ;;  %v873_v1 = vld [vmem:[%s1243_s8] ss:$0 sm:$0xff] }
 0x3bb   :  { %382 = vrot.lane.b32.xlu1 %v365_v20, %s919_s1 }
 0x3c3   :  { %388 = vrot.lane.b32.xlu1 %v329_v24, %s919_s1 }
 0x3cb   :  { %390 = vrot.lane.b32.xlu1 %v367_v27, %s919_s1 }
 0x3d3   :  { %396 = vrot.lane.b32.xlu1 %v331_v32, %s919_s1 }
 0x405   :  { %v727_v41 = vpop.xlane.xlu1 %726 }
 0x406   :  { %v738_v44 = vmul.f32 %v737_v43, %v727_v41 }
 0x408   :  { %v740_v45 = vsub.f32 %v723_v7, %v738_v44 }
 0x40a   :  { %v742_v46 = vmul.f32 %v740_v45, %v740_v45 }
 0x40c   :  { %v744_v47 = vsel %vm42_vm1, %v742_v46, 0.0 }
 0x40d   :  { %745 = vadd.xlane.f32.xlu0 %v744_v47 }
 0x41d   :  { %v375_v48 = vpop.permute.xlu1 %374 }
 0x41e   :  { %v730_v49 = vpop.xlane.xlu2 %729  ;;  %v403_v36 = vsel %vm228_vm3, %v1080_v22, %v375_v48 }
 0x41f   :  { %v739_v50 = vmul.f32 %v737_v43, %v730_v49 }
 0x421   :  { %v1174_v51 = vsub.f32 %v724_v13, %v739_v50 }
 0x423   :  { %v743_v52 = vmul.f32 %v1174_v51, %v1174_v51 }
 0x425   :  { %v381_v53 = vpop.permute.xlu1 %380  ;;  %v747_v55 = vsel %vm42_vm1, %v743_v52, 0.0 }
 0x426   :  { %748 = vadd.xlane.f32.xlu1 %v747_v55  ;;  %v404_v61 = vsel %vm228_vm3, %v1070_v4, %v381_v53 }
 0x427   :  { %v418_v22 = vrot.slane %v404_v61, 7 }
 0x429   :  { %v425_v4 = vsel %vm424_vm15, %v402_v11, %v418_v22 }
 0x42d   :  { %v383_v58 = vpop.permute.xlu1 %382 }
 0x42e   :  { %v405_v33 = vsel %vm228_vm3, %v1084_v30, %v383_v58 }
 0x42f   :  { %v421_v57 = vrot.slane %v405_v33, 7 }
 0x431   :  { %v1184_v29 = vsel %vm424_vm15, %v403_v36, %v421_v57 }
 0x435   :  { %v389_v54 = vpop.permute.xlu1 %388 }
 0x436   :  { %v406_v30 = vsel %vm228_vm3, %v1073_v8, %v389_v54 }
 0x437   :  { %v419_v0 = vrot.slane %v406_v30, 6 }
 0x43d   :  { %v391_v59 = vpop.permute.xlu1 %390 }
 0x43e   :  { %v407_v40 = vsel %vm228_vm3, %v1086_v31, %v391_v59 }
 0x43f   :  { %398 = vrot.lane.b32.xlu1 %v369_v60, %s919_s1 }
 0x445   :  { %v397_v21 = vpop.permute.xlu1 %396 }
 0x446   :  { %v408_v63 = vsel %vm228_vm3, %v1077_v14, %v397_v21 }
 0x447   :  { %v420_v3 = vrot.slane %v408_v63, 5 }
 0x449   :  { %v427_v8 = vsel %vm426_vm0, %v419_v0, %v420_v3 }
 0x44a   :  { %v429_v5 = vsel %vm428_vm2, %v425_v4, %v427_v8 }
 0x44b   :  { %439 = vst.msk [vmem:[#allocation2] sm:$0xf] %vm1197_vm4, %v429_v5 }
 0x480   :  { %v746_v14 = vpop.xlane.xlu0 %745 }
 0x481   :  { %v750_v7 = vmul.f32 %v746_v14, %v737_v43 }
 0x483   :  { %v752_v9 = vadd.f32 1e-05, %v750_v7 }
 0x485   :  { %884 = vrsqrt.f32 %v752_v9  ;;  %vm760_vm6 = vweird.f32 %v752_v9 }
 0x48b   :  { %v885_v10 = vpop.eup %884 }
 0x48c   :  { %v755_v12 = vmul.f32 %v885_v10, %v752_v9  ;;  %vm761_vm5 = vweird.f32 %v885_v10 }
 0x48d   :  { %vm762_vm7 = vmor %vm760_vm6, %vm761_vm5 }
 0x48e   :  { %v756_v56 = vmul.f32 %v885_v10, %v755_v12 }
 0x490   :  { %v757_v6 = vmul.f32 0.5, %v756_v56 }
 0x492   :  { %v758_v13 = vsub.f32 1.5, %v757_v6 }
 0x494   :  { %v759_v16 = vmul.f32 %v885_v10, %v758_v13 }
 0x496   :  { %v763_v18 = vsel %vm762_vm7, %v885_v10, %v759_v16 }
 0x497   :  { %v774_v19 = vmul.f32 %v763_v18, %v740_v45  ;;  %v422_v45 = vrot.slane %v407_v40, 6 }
 0x499   :  { %v780_v20 = vmul.f32 %v872_v17, %v774_v19  ;;  %v749_v2 = vpop.xlane.xlu1 %748 }
 0x49a   :  { %v751_v24 = vmul.f32 %v749_v2, %v737_v43 }
 0x49b   :  { %v786_v26 = vadd.f32 %v873_v1, %v780_v20 }
 0x49c   :  { %v753_v27 = vadd.f32 1e-05, %v751_v24 }
 0x49d   :  { %788 = vst.msk [vmem:[%s1244_s9] sm:$0xff] %vm42_vm1, %v786_v26 }
 0x49e   :  { %886 = vrsqrt.f32 %v753_v27  ;;  %vm770_vm9 = vweird.f32 %v753_v27 }
 0x4a4   :  { %v887_v28 = vpop.eup %886 }
 0x4a5   :  { %v765_v32 = vmul.f32 %v887_v28, %v753_v27  ;;  %vm771_vm8 = vweird.f32 %v887_v28 }
 0x4a6   :  { %vm772_vm10 = vmor %vm770_vm9, %vm771_vm8 }
 0x4a7   :  { %v766_v34 = vmul.f32 %v887_v28, %v765_v32 }
 0x4a9   :  { %v767_v23 = vmul.f32 0.5, %v766_v34 }
 0x4ab   :  { %v768_v37 = vsub.f32 1.5, %v767_v23 }
 0x4ad   :  { %v769_v38 = vmul.f32 %v887_v28, %v768_v37 }
 0x4af   :  { %v773_v39 = vsel %vm772_vm10, %v887_v28, %v769_v38 }
 0x4b0   :  { %v775_v42 = vmul.f32 %v773_v39, %v1174_v51 }
 0x4b1   :  { %v399_v43 = vpop.permute.xlu1 %398 }
 0x4b2   :  { %v781_v41 = vmul.f32 %v872_v17, %v775_v42  ;;  %v409_v44 = vsel %vm228_vm3, %v1089_v35, %v399_v43 }
 0x4b3   :  { %v423_v46 = vrot.slane %v409_v44, 5 }
 0x4b4   :  { %v787_v47 = vadd.f32 %v873_v1, %v781_v41 }
 0x4b5   :  { %v431_v48 = vsel %vm426_vm0, %v422_v45, %v423_v46 }
 0x4b6   :  { %789 = vst.msk [vmem:[%s1244_s9 + $0x8] sm:$0xff] %vm42_vm1, %v787_v47  ;;  %v432_v31 = vsel %vm428_vm2, %v1184_v29, %v431_v48 }
 0x4b7   :  { %440 = vst.msk [vmem:[#allocation2 + $0x4] sm:$0xf] %vm1197_vm4, %v432_v31 }
 0x4b8   :  { %804 = dma.vmem_to_hbm [thread:$0]  %s797_s17, 128, %s799_s15, [#allocation3], %s919_s1, %s919_s1, %s922_s10  }
 0x4b9   :  { %912 = dma.done.wait [#allocation3], 128  }
 0x4ba   :  { %913 = vsyncadd [#allocation3], 4294967168 }
 0x4bb   :  { %811 = vsyncpa [#allocation3], 1 }

</bundles_post_ra>
